<compile_context>
chip_gen: v6e
topology: v6e:2x2x1
jax: 0.10.0
libtpu: 0.0.40
codegen_flags: <defaults>
</compile_context>

<pallas_src>
import functools
import math

import jax
import jax.numpy as jnp
from jax import lax
from jax.experimental import pallas as pl
from jax.experimental.pallas import tpu as pltpu


# ------------------------- config (small, synthetic) -------------------------
BATCH = 2
SEQ = 16
HIDDEN = 64
NUM_HEADS = 4
NUM_KV_HEADS = 2
HEAD_DIM = 16
LAYER_IDX = 1
ROPE_THETA = 10000.0
RMS_EPS = 1e-6
LAMBDA_STD = 0.1


def lambda_init_fn(layer_idx):
    return 0.8 - 0.6 * math.exp(-0.3 * layer_idx)


# ------------------------------ fused Pallas kernel ---------------------------
def _fused_diffllama_kernel(lam_ref, x_ref, wqkv_ref, wo_ref, cos_ref, sin_ref,
                            bias_ref, o_ref, *, seq, hidden_dim, num_heads,
                            num_kv_heads, head_dim, eps):
    """Entire DiffLlama attention layer for one batch element (all in VMEM)."""
    nh, nkv, hd, s, h = num_heads, num_kv_heads, head_dim, seq, hidden_dim
    nh2 = nh // 2            # head pairs
    half = hd // 2
    sh = s // 2              # lane-dense packing: 2 sequence rows per block row

    lam = lam_ref[0]                                       # lambda_full (SMEM)

    # Lane-dense input block (S/2, 2*H): row i = [x[i] | x[i + S/2]].
    x_ld = x_ref[0]
    x = jnp.concatenate([x_ld[:, :h], x_ld[:, h:]], axis=0).astype(jnp.float32)

    # Fused Q/K/V projection (1/sqrt(hd) already folded into the Q columns).
    qkv = jnp.dot(x, wqkv_ref[...], preferred_element_type=jnp.float32)
    k_off = nh * hd
    v_off = nh * hd + nkv * hd

    # Stack heads along the sublane (M) axis so attention runs as ONE score
    # matmul and ONE P@V matmul for all heads.
    q_all = jnp.concatenate(
        [qkv[:, i * hd:(i + 1) * hd] for i in range(nh)], axis=0)       # (NH*S, HD)
    k_all = jnp.concatenate(
        [qkv[:, k_off + j * hd:k_off + (j + 1) * hd] for j in range(nkv)],
        axis=0)                                                         # (NKV*S, HD)

    # RoPE with pre-tiled tables; rotate-half sign is folded into sin_ref.
    def rope(t, c, si):
        rot = jnp.concatenate([t[:, half:], t[:, :half]], axis=-1)
        return t * c + rot * si

    q_all = rope(q_all, cos_ref[...], sin_ref[...])
    k_all = rope(k_all, cos_ref[:nkv * s, :], sin_ref[:nkv * s, :])

    # Differential value concat: for num_kv_heads == 2 every kv head's
    # [value1 | value2] block is identical and equals the natural V lane slab.
    v_slab = qkv[:, v_off:v_off + 2 * hd]                  # (S, 2*HD)
    v_big = jnp.concatenate([v_slab, v_slab], axis=0)      # (NKV*S, 2*HD)

    # Scores + precomputed additive causal/GQA mask bias (0 / -1e30).
    scores = lax.dot_general(q_all, k_all, (((1,), (1,)), ((), ())),
                             preferred_element_type=jnp.float32)
    scores = scores + bias_ref[...]

    # Softmax; 1/denom applied after P@V via the EUP approximate reciprocal.
    m = jnp.max(scores, axis=-1, keepdims=True)
    p = jnp.exp(scores - m)
    denom = jnp.sum(p, axis=-1, keepdims=True)
    o_all = jnp.dot(p, v_big, preferred_element_type=jnp.float32)       # (NH*S, 2*HD)
    o_all = o_all * pl.reciprocal(denom, approx=True)

    # Differential combine (first NH/2 heads minus lambda * second NH/2 heads),
    # then RMS groupnorm over 2*HD.  (1 - lambda_init) is folded into wo.
    d = o_all[:nh2 * s, :] - lam * o_all[nh2 * s:, :]      # (NH2*S, 2*HD)
    ms = jnp.mean(d * d, axis=-1, keepdims=True)
    d = d * lax.rsqrt(ms + eps)

    # O projection as a sum over head pairs (no pair->lane relayout).
    out = jnp.dot(d[:s, :], wo_ref[:2 * hd, :], preferred_element_type=jnp.float32)
    for pidx in range(1, nh2):
        out = out + jnp.dot(d[pidx * s:(pidx + 1) * s, :],
                            wo_ref[pidx * 2 * hd:(pidx + 1) * 2 * hd, :],
                            preferred_element_type=jnp.float32)

    # Lane-dense output block (S/2, 2*H): row i = [out[i] | out[i + S/2]].
    packed = jnp.concatenate([out[:sh, :], out[sh:, :]], axis=-1)
    o_ref[0] = packed.astype(o_ref.dtype)


def diffllama_flash_attention2_forward(params, hidden_states, cos, sin):
    b, s, h = hidden_states.shape
    nh, nkv, hd = NUM_HEADS, NUM_KV_HEADS, HEAD_DIM
    g = nh // nkv
    assert nh % 2 == 0 and nh % nkv == 0 and hd % 2 == 0
    assert nkv == 2, "V [value1|value2] collapse below relies on num_kv_heads == 2"
    assert s % 2 == 0 and (2 * h) % 128 == 0, "lane-dense (S/2, 2H) packing"
    lambda_init = lambda_init_fn(LAYER_IDX)

    # ---- host-side weight / table prep (one-time for a real model) ----
    # 1/sqrt(hd) folded into Q columns; (1 - lambda_init) folded into W_o.
    wqkv = jnp.concatenate([params["q_w"] / math.sqrt(hd),
                            params["k_w"], params["v_w"]], axis=1)
    wo_scaled = (1.0 - lambda_init) * params["o_w"]

    lambda_1 = jnp.exp(jnp.sum(params["lambda_q1"] * params["lambda_k1"],
                               dtype=jnp.float32))
    lambda_2 = jnp.exp(jnp.sum(params["lambda_q2"] * params["lambda_k2"],
                               dtype=jnp.float32))
    lambda_full = (lambda_1 - lambda_2 + lambda_init).reshape(1).astype(jnp.float32)

    # Pre-tiled RoPE tables for the stacked-head layout; rotate-half sign folded
    # into the sin table.  K uses the first NKV*S rows of the same tables.
    sign = jnp.concatenate([-jnp.ones((hd // 2,), jnp.float32),
                            jnp.ones((hd // 2,), jnp.float32)])
    cos_t = jnp.tile(cos, (nh, 1)).astype(jnp.float32)                 # (NH*S, HD)
    sin_t = jnp.tile(sin * sign[None, :], (nh, 1)).astype(jnp.float32)

    # Precomputed additive causal & GQA mask bias over the stacked layout.
    r = jnp.arange(nh * s)
    c = jnp.arange(nkv * s)
    ok = ((c[None, :] % s) <= (r[:, None] % s)) & \
         ((c[None, :] // s) == ((r[:, None] // s) // g))
    bias = jnp.where(ok, 0.0, -1e30).astype(jnp.float32)               # (NH*S, NKV*S)

    # Lane-dense packing (layout plumbing only): (B,S,H) -> (B, S/2, 2H),
    # row i = [x[i] | x[i + S/2]].
    x_packed = hidden_states.reshape(b, 2, s // 2, h).transpose(0, 2, 1, 3) \
                            .reshape(b, s // 2, 2 * h)

    kernel = functools.partial(
        _fused_diffllama_kernel, seq=s, hidden_dim=h, num_heads=nh,
        num_kv_heads=nkv, head_dim=hd, eps=RMS_EPS)

    out_packed = pl.pallas_call(
        kernel,
        out_shape=jax.ShapeDtypeStruct((b, s // 2, 2 * h), hidden_states.dtype),
        grid=(b,),   # batch axis, "parallel" -> both TensorCores busy on v7x
        in_specs=[
            pl.BlockSpec(memory_space=pltpu.MemorySpace.SMEM),         # lambda_full
            pl.BlockSpec((1, s // 2, 2 * h), lambda i: (i, 0, 0)),     # x (lane-dense)
            pl.BlockSpec(wqkv.shape, lambda i: (0, 0)),                # fused W_qkv
            pl.BlockSpec(wo_scaled.shape, lambda i: (0, 0)),           # scaled W_o
            pl.BlockSpec(cos_t.shape, lambda i: (0, 0)),               # cos (NH*S, HD)
            pl.BlockSpec(sin_t.shape, lambda i: (0, 0)),               # signed sin
            pl.BlockSpec(bias.shape, lambda i: (0, 0)),                # mask bias
        ],
        out_specs=pl.BlockSpec((1, s // 2, 2 * h), lambda i: (i, 0, 0)),
        compiler_params=pltpu.CompilerParams(dimension_semantics=("parallel",)),
    )(lambda_full, x_packed, wqkv, wo_scaled, cos_t, sin_t, bias)

    # Undo the lane-dense packing (tiny wrapper-side transpose).
    return out_packed.reshape(b, s // 2, 2, h).transpose(0, 2, 1, 3).reshape(b, s, h)


# --------------------------------- helpers ------------------------------------
def make_rope(seq, dim, theta):
    inv_freq = 1.0 / (theta ** (jnp.arange(0, dim, 2, dtype=jnp.float32) / dim))
    pos = jnp.arange(seq, dtype=jnp.float32)
    freqs = pos[:, None] * inv_freq[None, :]
    emb = jnp.concatenate([freqs, freqs], axis=-1)
    return jnp.cos(emb), jnp.sin(emb)                      # each (S, HD)


def init_params(key):
    ks = jax.random.split(key, 8)
    w = 0.02
    return {
        "q_w": w * jax.random.normal(ks[0], (HIDDEN, NUM_HEADS * HEAD_DIM), jnp.float32),
        "k_w": w * jax.random.normal(ks[1], (HIDDEN, NUM_KV_HEADS * HEAD_DIM), jnp.float32),
        "v_w": w * jax.random.normal(ks[2], (HIDDEN, NUM_KV_HEADS * HEAD_DIM), jnp.float32),
        "o_w": w * jax.random.normal(ks[3], (NUM_HEADS * HEAD_DIM, HIDDEN), jnp.float32),
        "lambda_q1": LAMBDA_STD * jax.random.normal(ks[4], (HEAD_DIM,), jnp.float32),
        "lambda_k1": LAMBDA_STD * jax.random.normal(ks[5], (HEAD_DIM,), jnp.float32),
        "lambda_q2": LAMBDA_STD * jax.random.normal(ks[6], (HEAD_DIM,), jnp.float32),
        "lambda_k2": LAMBDA_STD * jax.random.normal(ks[7], (HEAD_DIM,), jnp.float32),
    }
    # attention_bias=False (Llama default), so no projection biases.
    # groupnorm is nn.RMSNorm(2*head_dim, elementwise_affine=False): no weight.


# --------------------------- pure-JAX reference check --------------------------
def reference_forward(params, hidden_states, cos, sin):
    b, s, _ = hidden_states.shape
    nh, nkv, hd = NUM_HEADS, NUM_KV_HEADS, HEAD_DIM
    g = nh // nkv
    lambda_init = lambda_init_fn(LAYER_IDX)

    x2d = hidden_states.reshape(b * s, HIDDEN)
    q = (x2d @ params["q_w"]).reshape(b, s, nh, hd).transpose(0, 2, 1, 3)
    k = (x2d @ params["k_w"]).reshape(b, s, nkv, hd).transpose(0, 2, 1, 3)
    v = (x2d @ params["v_w"]).reshape(b, s, nkv, hd).transpose(0, 2, 1, 3)

    def rot_half(x):
        h2 = x.shape[-1] // 2
        return jnp.concatenate([-x[..., h2:], x[..., :h2]], axis=-1)

    c, si = cos[None, None], sin[None, None]
    q = q * c + rot_half(q) * si
    k = k * c + rot_half(k) * si

    kv_idx = jnp.arange(nh) // g
    v1 = jnp.take(v, kv_idx % (nkv // 2), axis=1)
    v2 = jnp.take(v, nkv // 2 + kv_idx % (nkv // 2), axis=1)
    k_full = jnp.take(k, kv_idx, axis=1)

    scores = jnp.einsum("bhqd,bhkd->bhqk", q, k_full) / math.sqrt(hd)
    mask = jnp.tril(jnp.ones((s, s), dtype=bool))
    scores = jnp.where(mask[None, None], scores, -1e30)
    p = jax.nn.softmax(scores, axis=-1)
    o1 = jnp.einsum("bhqk,bhkd->bhqd", p, v1)
    o2 = jnp.einsum("bhqk,bhkd->bhqd", p, v2)
    attn = jnp.concatenate([o1, o2], axis=-1)              # (B, NH, S, 2*HD)

    lambda_1 = jnp.exp(jnp.sum(params["lambda_q1"] * params["lambda_k1"]))
    lambda_2 = jnp.exp(jnp.sum(params["lambda_q2"] * params["lambda_k2"]))
    lambda_full = lambda_1 - lambda_2 + lambda_init

    a1, a2 = attn[:, : nh // 2], attn[:, nh // 2:]
    d = a1 - lambda_full * a2
    ms = jnp.mean(d * d, axis=-1, keepdims=True)
    d = (1.0 - lambda_init) * d * lax.rsqrt(ms + RMS_EPS)
    d = d.transpose(0, 2, 1, 3).reshape(b * s, nh * hd)
    return (d @ params["o_w"]).reshape(b, s, HIDDEN)


if __name__ == "__main__":
    key = jax.random.PRNGKey(0)
    pkey, xkey = jax.random.split(key)
    params = init_params(pkey)
    hidden_states = jax.random.normal(xkey, (BATCH, SEQ, HIDDEN), jnp.float32)
    cos, sin = make_rope(SEQ, HEAD_DIM, ROPE_THETA)

    out = diffllama_flash_attention2_forward(params, hidden_states, cos, sin)
    out = jax.block_until_ready(out)

    ref = reference_forward(params, hidden_states, cos, sin)
    assert out.shape == (BATCH, SEQ, HIDDEN)
    max_err = float(jnp.max(jnp.abs(out - ref)))
    # Tolerance covers the EUP approximate reciprocal used for the softmax denom.
    assert jnp.allclose(out, ref, atol=2e-3, rtol=2e-3), max_err

    print("KERNEL_OK")
</pallas_src>

<mosaic_0001>
module attributes {stable_mosaic.version = 11 : i64} {
  func.func @_fused_diffllama_kernel(%arg0: i32, %arg1: memref<1xf32, #tpu.memory_space<smem>>, %arg2: memref<1x8x128xf32, #tpu.memory_space<vmem>>, %arg3: memref<64x128xf32, #tpu.memory_space<vmem>>, %arg4: memref<64x64xf32, #tpu.memory_space<vmem>>, %arg5: memref<64x16xf32, #tpu.memory_space<vmem>>, %arg6: memref<64x16xf32, #tpu.memory_space<vmem>>, %arg7: memref<64x32xf32, #tpu.memory_space<vmem>>, %arg8: memref<1x8x128xf32, #tpu.memory_space<vmem>>) attributes {dimension_semantics = [#tpu.dimension_semantics<parallel>], iteration_bounds = array<i64: 2>, scalar_prefetch = 0 : i64, scratch_operands = 0 : i64, tpu.core_type = #tpu.core_type<tc>, window_params = [{transform_indices = @transform_0, window_bounds = array<i64: 1>}, {transform_indices = @transform_1, window_bounds = array<i64: 1, 8, 128>}, {pipeline_mode = #tpu.pipeline_mode<synchronous>, transform_indices = @transform_2, window_bounds = array<i64: 64, 128>}, {pipeline_mode = #tpu.pipeline_mode<synchronous>, transform_indices = @transform_3, window_bounds = array<i64: 64, 64>}, {pipeline_mode = #tpu.pipeline_mode<synchronous>, transform_indices = @transform_4, window_bounds = array<i64: 64, 16>}, {pipeline_mode = #tpu.pipeline_mode<synchronous>, transform_indices = @transform_5, window_bounds = array<i64: 64, 16>}, {pipeline_mode = #tpu.pipeline_mode<synchronous>, transform_indices = @transform_6, window_bounds = array<i64: 64, 32>}, {transform_indices = @transform_7, window_bounds = array<i64: 1, 8, 128>}]} {
    %c0 = arith.constant 0 : index
    %0 = memref.load %arg1[%c0] : memref<1xf32, #tpu.memory_space<smem>>
    %c0_0 = arith.constant 0 : index
    %c0_1 = arith.constant 0 : index
    %c0_2 = arith.constant 0 : index
    %1 = vector.load %arg2[%c0_0, %c0_1, %c0_2] : memref<1x8x128xf32, #tpu.memory_space<vmem>>, vector<1x8x128xf32>
    %2 = vector.shape_cast %1 : vector<1x8x128xf32> to vector<8x128xf32>
    %3 = vector.extract_strided_slice %2 {offsets = [0, 0], sizes = [8, 64], strides = [1, 1]} : vector<8x128xf32> to vector<8x64xf32>
    %4 = vector.extract_strided_slice %2 {offsets = [0, 64], sizes = [8, 64], strides = [1, 1]} : vector<8x128xf32> to vector<8x64xf32>
    %5 = tpu.concatenate %3, %4 in 0 : vector<8x64xf32>, vector<8x64xf32> -> vector<16x64xf32>
    %c0_3 = arith.constant 0 : index
    %c0_4 = arith.constant 0 : index
    %6 = vector.load %arg3[%c0_3, %c0_4] : memref<64x128xf32, #tpu.memory_space<vmem>>, vector<64x128xf32>
    %cst = arith.constant dense<0.000000e+00> : vector<16x128xf32>
    %7 = tpu.matmul %5, %6, %cst {dimension_numbers = #tpu.dot_dimension_numbers<[1], [0], [0], [1], [0, 0, 1, 1], [], []>} : vector<16x64xf32>, vector<64x128xf32>, vector<16x128xf32> -> vector<16x128xf32>
    %8 = vector.extract_strided_slice %7 {offsets = [0, 0], sizes = [16, 16], strides = [1, 1]} : vector<16x128xf32> to vector<16x16xf32>
    %9 = vector.extract_strided_slice %7 {offsets = [0, 16], sizes = [16, 16], strides = [1, 1]} : vector<16x128xf32> to vector<16x16xf32>
    %10 = vector.extract_strided_slice %7 {offsets = [0, 32], sizes = [16, 16], strides = [1, 1]} : vector<16x128xf32> to vector<16x16xf32>
    %11 = vector.extract_strided_slice %7 {offsets = [0, 48], sizes = [16, 16], strides = [1, 1]} : vector<16x128xf32> to vector<16x16xf32>
    %12 = tpu.concatenate %8, %9, %10, %11 in 0 : vector<16x16xf32>, vector<16x16xf32>, vector<16x16xf32>, vector<16x16xf32> -> vector<64x16xf32>
    %13 = vector.extract_strided_slice %7 {offsets = [0, 64], sizes = [16, 16], strides = [1, 1]} : vector<16x128xf32> to vector<16x16xf32>
    %14 = vector.extract_strided_slice %7 {offsets = [0, 80], sizes = [16, 16], strides = [1, 1]} : vector<16x128xf32> to vector<16x16xf32>
    %15 = tpu.concatenate %13, %14 in 0 : vector<16x16xf32>, vector<16x16xf32> -> vector<32x16xf32>
    %c0_5 = arith.constant 0 : index
    %c0_6 = arith.constant 0 : index
    %16 = vector.load %arg5[%c0_5, %c0_6] : memref<64x16xf32, #tpu.memory_space<vmem>>, vector<64x16xf32>
    %c0_7 = arith.constant 0 : index
    %c0_8 = arith.constant 0 : index
    %17 = vector.load %arg6[%c0_7, %c0_8] : memref<64x16xf32, #tpu.memory_space<vmem>>, vector<64x16xf32>
    %18 = vector.extract_strided_slice %12 {offsets = [0, 8], sizes = [64, 8], strides = [1, 1]} : vector<64x16xf32> to vector<64x8xf32>
    %19 = vector.extract_strided_slice %12 {offsets = [0, 0], sizes = [64, 8], strides = [1, 1]} : vector<64x16xf32> to vector<64x8xf32>
    %20 = tpu.concatenate %18, %19 in 1 : vector<64x8xf32>, vector<64x8xf32> -> vector<64x16xf32>
    %21 = arith.mulf %12, %16 : vector<64x16xf32>
    %22 = arith.mulf %20, %17 : vector<64x16xf32>
    %23 = arith.addf %21, %22 : vector<64x16xf32>
    %c0_9 = arith.constant 0 : index
    %c0_10 = arith.constant 0 : index
    %24 = vector.load %arg5[%c0_9, %c0_10] : memref<64x16xf32, #tpu.memory_space<vmem>>, vector<32x16xf32>
    %c0_11 = arith.constant 0 : index
    %c0_12 = arith.constant 0 : index
    %25 = vector.load %arg6[%c0_11, %c0_12] : memref<64x16xf32, #tpu.memory_space<vmem>>, vector<32x16xf32>
    %26 = vector.extract_strided_slice %15 {offsets = [0, 8], sizes = [32, 8], strides = [1, 1]} : vector<32x16xf32> to vector<32x8xf32>
    %27 = vector.extract_strided_slice %15 {offsets = [0, 0], sizes = [32, 8], strides = [1, 1]} : vector<32x16xf32> to vector<32x8xf32>
    %28 = tpu.concatenate %26, %27 in 1 : vector<32x8xf32>, vector<32x8xf32> -> vector<32x16xf32>
    %29 = arith.mulf %15, %24 : vector<32x16xf32>
    %30 = arith.mulf %28, %25 : vector<32x16xf32>
    %31 = arith.addf %29, %30 : vector<32x16xf32>
    %32 = vector.extract_strided_slice %7 {offsets = [0, 96], sizes = [16, 32], strides = [1, 1]} : vector<16x128xf32> to vector<16x32xf32>
    %33 = tpu.concatenate %32, %32 in 0 : vector<16x32xf32>, vector<16x32xf32> -> vector<32x32xf32>
    %cst_13 = arith.constant dense<0.000000e+00> : vector<64x32xf32>
    %34 = tpu.matmul %23, %31, %cst_13 {dimension_numbers = #tpu.dot_dimension_numbers<[1], [1], [0], [0], [0, 0, 1, 0], [], []>} : vector<64x16xf32>, vector<32x16xf32>, vector<64x32xf32> -> vector<64x32xf32>
    %c0_14 = arith.constant 0 : index
    %c0_15 = arith.constant 0 : index
    %35 = vector.load %arg7[%c0_14, %c0_15] : memref<64x32xf32, #tpu.memory_space<vmem>>, vector<64x32xf32>
    %36 = arith.addf %34, %35 : vector<64x32xf32>
    %cst_16 = arith.constant dense<0xFF800000> : vector<64xf32>
    %37 = vector.multi_reduction <maximumf>, %36, %cst_16 [1] : vector<64x32xf32> to vector<64xf32>
    %38 = vector.shape_cast %37 : vector<64xf32> to vector<64x1xf32>
    %39 = vector.broadcast %38 : vector<64x1xf32> to vector<64x32xf32>
    %40 = arith.subf %36, %39 : vector<64x32xf32>
    %41 = math.exp %40 : vector<64x32xf32>
    %cst_17 = arith.constant dense<0.000000e+00> : vector<64xf32>
    %42 = vector.multi_reduction <add>, %41, %cst_17 [1] : vector<64x32xf32> to vector<64xf32>
    %43 = vector.shape_cast %42 : vector<64xf32> to vector<64x1xf32>
    %cst_18 = arith.constant dense<0.000000e+00> : vector<64x32xf32>
    %44 = tpu.matmul %41, %33, %cst_18 {dimension_numbers = #tpu.dot_dimension_numbers<[1], [0], [0], [1], [0, 0, 1, 1], [], []>} : vector<64x32xf32>, vector<32x32xf32>, vector<64x32xf32> -> vector<64x32xf32>
    %45 = tpu.reciprocal %43 {approx = true} : vector<64x1xf32> -> vector<64x1xf32>
    %46 = vector.broadcast %45 : vector<64x1xf32> to vector<64x32xf32>
    %47 = arith.mulf %44, %46 : vector<64x32xf32>
    %48 = vector.extract_strided_slice %47 {offsets = [0, 0], sizes = [32, 32], strides = [1, 1]} : vector<64x32xf32> to vector<32x32xf32>
    %49 = vector.extract_strided_slice %47 {offsets = [32, 0], sizes = [32, 32], strides = [1, 1]} : vector<64x32xf32> to vector<32x32xf32>
    %50 = vector.broadcast %0 : f32 to vector<32x32xf32>
    %51 = arith.mulf %50, %49 : vector<32x32xf32>
    %52 = arith.subf %48, %51 : vector<32x32xf32>
    %53 = arith.mulf %52, %52 : vector<32x32xf32>
    %cst_19 = arith.constant dense<0.000000e+00> : vector<32xf32>
    %54 = vector.multi_reduction <add>, %53, %cst_19 [1] : vector<32x32xf32> to vector<32xf32>
    %55 = vector.shape_cast %54 : vector<32xf32> to vector<32x1xf32>
    %cst_20 = arith.constant 3.200000e+01 : f32
    %56 = vector.broadcast %cst_20 : f32 to vector<32x1xf32>
    %57 = arith.divf %55, %56 : vector<32x1xf32>
    %cst_21 = arith.constant 9.99999997E-7 : f32
    %58 = vector.broadcast %cst_21 : f32 to vector<32x1xf32>
    %59 = arith.addf %57, %58 : vector<32x1xf32>
    %60 = math.rsqrt %59 : vector<32x1xf32>
    %61 = vector.broadcast %60 : vector<32x1xf32> to vector<32x32xf32>
    %62 = arith.mulf %52, %61 : vector<32x32xf32>
    %63 = vector.extract_strided_slice %62 {offsets = [0, 0], sizes = [16, 32], strides = [1, 1]} : vector<32x32xf32> to vector<16x32xf32>
    %c0_22 = arith.constant 0 : index
    %c0_23 = arith.constant 0 : index
    %64 = vector.load %arg4[%c0_22, %c0_23] : memref<64x64xf32, #tpu.memory_space<vmem>>, vector<32x64xf32>
    %cst_24 = arith.constant dense<0.000000e+00> : vector<16x64xf32>
    %65 = tpu.matmul %63, %64, %cst_24 {dimension_numbers = #tpu.dot_dimension_numbers<[1], [0], [0], [1], [0, 0, 1, 1], [], []>} : vector<16x32xf32>, vector<32x64xf32>, vector<16x64xf32> -> vector<16x64xf32>
    %66 = vector.extract_strided_slice %62 {offsets = [16, 0], sizes = [16, 32], strides = [1, 1]} : vector<32x32xf32> to vector<16x32xf32>
    %c32 = arith.constant 32 : index
    %c0_25 = arith.constant 0 : index
    %67 = vector.load %arg4[%c32, %c0_25] : memref<64x64xf32, #tpu.memory_space<vmem>>, vector<32x64xf32>
    %cst_26 = arith.constant dense<0.000000e+00> : vector<16x64xf32>
    %68 = tpu.matmul %66, %67, %cst_26 {dimension_numbers = #tpu.dot_dimension_numbers<[1], [0], [0], [1], [0, 0, 1, 1], [], []>} : vector<16x32xf32>, vector<32x64xf32>, vector<16x64xf32> -> vector<16x64xf32>
    %69 = arith.addf %65, %68 : vector<16x64xf32>
    %70 = vector.extract_strided_slice %69 {offsets = [0, 0], sizes = [8, 64], strides = [1, 1]} : vector<16x64xf32> to vector<8x64xf32>
    %71 = vector.extract_strided_slice %69 {offsets = [8, 0], sizes = [8, 64], strides = [1, 1]} : vector<16x64xf32> to vector<8x64xf32>
    %72 = tpu.concatenate %70, %71 in 1 : vector<8x64xf32>, vector<8x64xf32> -> vector<8x128xf32>
    %c0_27 = arith.constant 0 : index
    %c0_28 = arith.constant 0 : index
    %c0_29 = arith.constant 0 : index
    %73 = vector.load %arg8[%c0_27, %c0_28, %c0_29] : memref<1x8x128xf32, #tpu.memory_space<vmem>>, vector<1x8x128xf32>
    %74 = vector.shape_cast %73 : vector<1x8x128xf32> to vector<8x128xf32>
    %75 = vector.shape_cast %72 : vector<8x128xf32> to vector<1x8x128xf32>
    tpu.vector_store %arg8[%c0_27, %c0_28, %c0_29], %75 {strides = array<i32>} : memref<1x8x128xf32, #tpu.memory_space<vmem>>, vector<1x8x128xf32>,
    return
  }
  func.func @transform_0(%arg0: i32) -> i32 {
    %c0_i32 = arith.constant 0 : i32
    %c0_i32_0 = arith.constant 0 : i32
    return %c0_i32 : i32
  }
  func.func @transform_1(%arg0: i32) -> (i32, i32, i32) {
    %c0_i32 = arith.constant 0 : i32
    %c0_i32_0 = arith.constant 0 : i32
    %c0_i32_1 = arith.constant 0 : i32
    return %arg0, %c0_i32, %c0_i32_0 : i32, i32, i32
  }
  func.func @transform_2(%arg0: i32) -> (i32, i32) {
    %c0_i32 = arith.constant 0 : i32
    %c0_i32_0 = arith.constant 0 : i32
    %c0_i32_1 = arith.constant 0 : i32
    return %c0_i32, %c0_i32_0 : i32, i32
  }
  func.func @transform_3(%arg0: i32) -> (i32, i32) {
    %c0_i32 = arith.constant 0 : i32
    %c0_i32_0 = arith.constant 0 : i32
    %c0_i32_1 = arith.constant 0 : i32
    return %c0_i32, %c0_i32_0 : i32, i32
  }
  func.func @transform_4(%arg0: i32) -> (i32, i32) {
    %c0_i32 = arith.constant 0 : i32
    %c0_i32_0 = arith.constant 0 : i32
    %c0_i32_1 = arith.constant 0 : i32
    return %c0_i32, %c0_i32_0 : i32, i32
  }
  func.func @transform_5(%arg0: i32) -> (i32, i32) {
    %c0_i32 = arith.constant 0 : i32
    %c0_i32_0 = arith.constant 0 : i32
    %c0_i32_1 = arith.constant 0 : i32
    return %c0_i32, %c0_i32_0 : i32, i32
  }
  func.func @transform_6(%arg0: i32) -> (i32, i32) {
    %c0_i32 = arith.constant 0 : i32
    %c0_i32_0 = arith.constant 0 : i32
    %c0_i32_1 = arith.constant 0 : i32
    return %c0_i32, %c0_i32_0 : i32, i32
  }
  func.func @transform_7(%arg0: i32) -> (i32, i32, i32) {
    %c0_i32 = arith.constant 0 : i32
    %c0_i32_0 = arith.constant 0 : i32
    %c0_i32_1 = arith.constant 0 : i32
    return %arg0, %c0_i32, %c0_i32_0 : i32, i32, i32
  }
}

</mosaic_0001>

<bundles_post_ra>
// kernel: tpu_custom_call.1
= control target key start
LH: loop header
LB: loop body
LE: loop exit
PB: predicated region body
PF: predicated region fallthrough
CT: control target
= control target key end

     0   :  { %s1999_s0 = inlined_call_operand.<no memory space> [shape: f32[1], index: 0, kind: input, shape index: {}]   ;;  %s2000_s1 = inlined_call_operand.vmem [shape: f32[2,8,128], index: 1, kind: input, shape index: {}]   ;;  %s2001_s2 = inlined_call_operand.vmem [shape: f32[64,128], index: 2, kind: input, shape index: {}]   ;;  %s2002_s3 = inlined_call_operand.vmem [shape: f32[64,64], index: 3, kind: input, shape index: {}]   ;;  %s2003_s4 = inlined_call_operand.vmem [shape: f32[64,16], index: 4, kind: input, shape index: {}]   ;;  %s2004_s5 = inlined_call_operand.vmem [shape: f32[64,16], index: 5, kind: input, shape index: {}]   ;;  %s2005_s6 = inlined_call_operand.vmem [shape: f32[64,32], index: 6, kind: input, shape index: {}]   ;;  %s2006_s7 = inlined_call_operand.hbm [shape: f32[2,8,128], index: 7, kind: output, shape index: {}]  }
   0x1   :  { %12 = sst [smem:[#allocation2]] %s1999_s0 }
   0x2   :  { %13 = vsyncpa [#allocation4], 0 }
   0x3   :  { %15 = vsyncpa [#allocation4 + $0x1], 0  ;;  %s1596_s26 = smov 0   ;;  %s1598_s27 = smov 0  }
   0x4   :  { %s1600_s28 = smov 0   ;;  %s1602_s29 = smov 0  }
   0x5 LB: > { %s1617_s0 = sadd.s32 4294967295, %s1541_s29   ;;  %s1230_s30 = sadd.s32 4294967294, %s1541_s29   ;;  %s1541_s29 = sphi %s1602_s29, %s2012_s29   ;;  %s1537_s28 = sphi %s1600_s28, %s2011_s28   ;;  %s1533_s27 = sphi %s1598_s27, %s2010_s27   ;;  %s1529_s26 = sphi %s1596_s26, %s2009_s26  }
   0x6   : > { %s1621_s8 = sadd.s32 1, %s1541_s29   ;;  %s180_s9 = sadd.s32 1, %s1537_s28 }
   0x7   : > { %s177_s10 = ssub.s32 %s1541_s29, %s1621_s8  ;;  %p190_p0 = scmp.ne.s32.totalorder %s1537_s28, %s1533_s27 }
   0x8   : > { %p178_p1 = scmp.eq.s32.totalorder %s177_s10, 0  ;;  %p191_p2 = scmp.eq.s32.totalorder %s1617_s0, 1 }
   0x9   : > { %p196_p3 = scmp.ne.s32.totalorder %s1533_s27, %s1529_s26  ;;  %p197_p4 = scmp.eq.s32.totalorder %s1230_s30, 1 }
   0xa   : > { %s1632_s11 = scalar_select %p178_p1, %s1537_s28, %s180_s9  }
   0xb   : > { %p1634_p5 = por %p191_p2, %p190_p0  ;;  %p1638_p6 = por %p197_p4, %p196_p3 }
   0xc   : > { %p1233_p7 = scmp.ge.s32.totalorder %s1541_s29, 1  ;;  %p240_p8 = scmp.lt.s32.totalorder %s1541_s29, 3 }
   0xe   : > { %p241_p9 = pnand %p1233_p7, %p240_p8 }
   0xf   : > { %p271_p10 = scmp.lt.s32.totalorder (!%p241_p9), %s1617_s0, 1  ;;  %s1543_s14 = smov (!%p241_p9), 64  }
  0x10   : > { %244 = sbr.rel (%p241_p9) target bundleno = 1894 (0x766), region = 48  ;;  %s1545_s22 = smov (!%p241_p9), 72  }
  0x11   : > { %s1546_s23 = smov (!%p241_p9), 56   ;;  %s1548_s19 = smov (!%p241_p9), 80  }
  0x12   : > { %s1549_s20 = smov (!%p241_p9), 8   ;;  %s1550_s15 = smov (!%p241_p9), 120  }
  0x13   : > { %s268_s24 = sand.u32 (!%p241_p9), 1, %s1533_s27  }
  0x14   : > { %s1234_s25 = sshll.u32 (!%p241_p9), %s268_s24, 3 }
  0x15   : > { %v287_v0 = vld [vmem:[%s2001_s2 + $0x38] sm:$0xff]  ;;  %v286_v1 = vld [vmem:[%s2001_s2 + $0x30] sm:$0xff]  ;;  %s272_s18 = scalar_select %p271_p10, %s1617_s0, 1  ;;  %v285_v2 = vld [vmem:[%s2001_s2 + $0x28] sm:$0xff]  ;;  %vm288_vm0 = vcmask 523264   ;;  %vm452_vm1 = vcmask 64512  }
  0x16   : > { %1312 = vmatprep.subr.mxu0 %v287_v0  ;;  %v284_v3 = vld [vmem:[%s2001_s2 + $0x20] sm:$0xff]  ;;  %v283_v5 = vld [vmem:[%s2001_s2 + $0x18] sm:$0xff]  ;;  %v282_v6 = vld [vmem:[%s2001_s2 + $0x10] sm:$0xff]  ;;  %vm577_vm2 = vcmask 130048   ;;  %vm715_vm3 = vcmask 261120   ;;  %s270_s9 = scalar_lea.vmem [#allocation3], %s1234_s25 }
  0x17   : > { %1313 = vmatpush3.msra.mxu0 %v287_v0  ;;  %s1235_s21 = sshll.u32 %s272_s18, 3  ;;  %v281_v7 = vld [vmem:[%s2001_s2 + $0x8] sm:$0xff]  ;;  %v280_v8 = vld [vmem:[%s2001_s2] sm:$0xff]  ;;  %v1697_v14 = vld [vmem:[%s2003_s4 + $0x18] sm:$0xff]  ;;  %s1547_s18 = smov 96  }
  0x18   : > { %1314 = vmatprep.subr.mxu0 %v286_v1  ;;  %s274_s30 = scalar_lea.vmem %s2000_s1, %s1235_s21  ;;  %s1544_s21 = smov 112   ;;  %v1704_v15 = vld [vmem:[%s2003_s4 + $0x10] sm:$0xff]  ;;  %v1711_v16 = vld [vmem:[%s2003_s4 + $0x8] sm:$0xff]  ;;  %v1718_v17 = vld [vmem:[%s2003_s4] sm:$0xff] }
  0x19   : > { %1315 = vmatpush3.msra.mxu0 %v286_v1  ;;  %v276_v4 = vld [vmem:[%s274_s30] sm:$0xff]  ;;  %v1733_v18 = vld [vmem:[%s2004_s5 + $0x18] sm:$0xff]  ;;  %v1740_v23 = vld [vmem:[%s2004_s5 + $0x10] sm:$0xff]  ;;  %s1263_s30 = sshll.u32 %s1617_s0, 7  ;;  %s1171_s10 = sshll.u32 %s270_s9, 4  ;;  %s1172_s10 = int_to_ptr.vmem [resolvable:$true] %s1171_s10 }
  0x1a   : > { %1316 = vmatprep.subr.mxu0 %v285_v2  ;;  %278 = vrot.lane.b32.xlu0 %v276_v4, %s1543_s14  ;;  %v1748_v28 = vld [vmem:[%s2004_s5 + $0x8] sm:$0xff]  ;;  %v396_v33 = vld [vmem:[%s2004_s5] sm:$0xff]  ;;  %s1963_s17 = scalar_lea.hbm %s2006_s7, %s1263_s30  ;;  %s1552_s0 = smov [#allocation3]  }
  0x1b   : > { %1317 = vmatpush3.msra.mxu0 %v285_v2  ;;  %1328 = vmatprep.mubr.msk.f32.mxu0 %vm288_vm0, %v276_v4 }
  0x1c   : > { %1318 = vmatprep.subr.mxu0 %v284_v3 }
  0x1d   : > { %1319 = vmatpush3.msra.mxu0 %v284_v3 }
  0x1e   : > { %1320 = vmatprep.subr.mxu0 %v283_v5 }
  0x1f   : > { %1321 = vmatpush3.msra.mxu0 %v283_v5 }
  0x20   : > { %1322 = vmatprep.subr.mxu0 %v282_v6 }
  0x21   : > { %1323 = vmatpush3.msra.mxu0 %v282_v6 }
  0x22   : > { %1324 = vmatprep.subr.mxu0 %v281_v7 }
  0x23   : > { %1325 = vmatpush3.msra.mxu0 %v281_v7 }
  0x24   : > { %1326 = vmatprep.subr.mxu0 %v280_v8 }
  0x25   : > { %1327 = vmatpush3.msra.mxu0 %v280_v8 }
  0x8c   : > { %v279_v9 = vpop.permute.xlu0 %278 }
  0x8d   : > { %1329 = vmatmul.mubr.msk.f32.vlgmr.msra.gmra.mxu0 %vm288_vm0, %v279_v9 }
 0x14d   : > { %v1676_v10 = vpop.f32.mrf.mxu0 }
 0x14e   : > { %372 = vrot.lane.b32.xlu0 %v1676_v10, %s1544_s21 }
 0x14f   : > { %v1679_v11 = vpop.f32.mrf.mxu0 }
 0x150   : > { %370 = vrot.lane.b32.xlu1 %v1679_v11, %s1544_s21  ;;  %v461_v61 = vmul.f32 %v1718_v17, %v1679_v11  ;;  %s275_s21 = sld [smem:[#allocation2]] }
 0x1c0   : > { %v1682_v12 = vpop.permute.xlu0 %372 }
 0x1c1   : > { %503 = vrot.lane.b32.xlu0 %v1682_v12, %s1545_s22  ;;  %491 = vrot.lane.b32.xlu1 %v1682_v12, %s1546_s23 }
 0x1c2   : > { %v1686_v13 = vpop.permute.xlu1 %370 }
 0x1c5   : > { %501 = vrot.lane.b32.xlu0 %v1686_v13, %s1545_s22  ;;  %489 = vrot.lane.b32.xlu1 %v1686_v13, %s1546_s23 }
 0x1c9   : > { %499 = vrot.lane.b32.xlu0 %v1676_v10, %s1545_s22  ;;  %487 = vrot.lane.b32.xlu1 %v1676_v10, %s1546_s23 }
 0x1cd   : > { %497 = vrot.lane.b32.xlu0 %v1679_v11, %s1545_s22  ;;  %485 = vrot.lane.b32.xlu1 %v1679_v11, %s1546_s23 }
 0x1d1   : > { %523 = vrot.lane.b32.xlu1 %v1697_v14, %s1543_s14 }
 0x1d5   : > { %521 = vrot.lane.b32.xlu1 %v1704_v15, %s1543_s14 }
 0x1d9   : > { %519 = vrot.lane.b32.xlu1 %v1711_v16, %s1543_s14 }
 0x1dd   : > { %517 = vrot.lane.b32.xlu1 %v1718_v17, %s1543_s14 }
 0x1e1   : > { %376 = vrot.lane.b32.xlu1 %v1679_v11, %s1547_s18 }
 0x1e5   : > { %382 = vrot.lane.b32.xlu1 %v1679_v11, %s1548_s19 }
 0x1e9   : > { %428 = vrot.lane.b32.xlu1 %v1679_v11, %s1549_s20 }
 0x1ed   : > { %430 = vrot.lane.b32.xlu1 %v1676_v10, %s1549_s20 }
 0x233   : > { %v504_v19 = vpop.permute.xlu0 %503  ;;  %v492_v20 = vpop.permute.xlu1 %491 }
 0x234   : > { %v512_v21 = vsel %vm452_vm1, %v492_v20, %v504_v19 }
 0x235   : > { %v536_v22 = vmul.f32 %v512_v21, %v1733_v18 }
 0x237   : > { %v502_v24 = vpop.permute.xlu0 %501  ;;  %547 = vrot.lane.b32.xlu0 %v536_v22, %s1543_s14  ;;  %v490_v25 = vpop.permute.xlu1 %489 }
 0x238   : > { %v511_v26 = vsel %vm452_vm1, %v490_v25, %v502_v24 }
 0x239   : > { %v535_v27 = vmul.f32 %v511_v26, %v1740_v23 }
 0x23b   : > { %v500_v29 = vpop.permute.xlu0 %499  ;;  %545 = vrot.lane.b32.xlu0 %v535_v27, %s1543_s14  ;;  %v488_v30 = vpop.permute.xlu1 %487  ;;  %v462_v27 = vmul.f32 %v1676_v10, %v1711_v16 }
 0x23c   : > { %v510_v31 = vsel %vm452_vm1, %v488_v30, %v500_v29  ;;  %v400_v29 = vld [vmem:[%s2004_s5 + $0x20] sm:$0xff] }
 0x23d   : > { %v534_v32 = vmul.f32 %v510_v31, %v1748_v28 }
 0x23f   : > { %v498_v34 = vpop.permute.xlu0 %497  ;;  %543 = vrot.lane.b32.xlu0 %v534_v32, %s1543_s14  ;;  %v486_v35 = vpop.permute.xlu1 %485 }
 0x240   : > { %v509_v36 = vsel %vm452_vm1, %v486_v35, %v498_v34  ;;  %v401_v34 = vld [vmem:[%s2004_s5 + $0x28] sm:$0xff] }
 0x241   : > { %v533_v37 = vmul.f32 %v509_v36, %v396_v33  ;;  %v464_v36 = vmul.f32 %v1697_v14, %v1682_v12 }
 0x243   : > { %541 = vrot.lane.b32.xlu0 %v533_v37, %s1543_s14  ;;  %v524_v38 = vpop.permute.xlu1 %523 }
 0x244   : > { %v532_v47 = vmul.f32 %v524_v38, %v1682_v12  ;;  %v394_v38 = vld [vmem:[%s2003_s4 + $0x30] sm:$0xff] }
 0x247   : > { %378 = vrot.lane.b32.xlu0 %v1676_v10, %s1547_s18  ;;  %v522_v39 = vpop.permute.xlu1 %521  ;;  %s1481_s18 = scalar_lea.vmem %s1172_s10, 128 }
 0x248   : > { %v531_v55 = vmul.f32 %v522_v39, %v1686_v13  ;;  %p1482_p11 = scmp.ne.s32.totalorder %s1172_s10, %s1481_s18 }
 0x24a   : > { %p1483_p12 = pnand %p1482_p11, %p1634_p5 }
 0x24b   : > { %384 = vrot.lane.b32.xlu0 %v1676_v10, %s1548_s19  ;;  %v520_v40 = vpop.permute.xlu1 %519  ;;  %s1485_s19 = sshll.u32 %s1552_s0, 4  ;;  %s1486_s19 = int_to_ptr.vmem [resolvable:$false] %s1485_s19 }
 0x24c   : > { %v530_v44 = vmul.f32 %v1676_v10, %v520_v40  ;;  %p1484_p13 = pneg %p1483_p12  ;;  %p1488_p0 = scmp.lt.s32.totalorder %s1172_s10, %s1486_s19 }
 0x24f   : > { %404 = vrot.lane.b32.xlu0 %v1679_v11, %s1550_s15  ;;  %v518_v43 = vpop.permute.xlu1 %517 }
 0x250   : > { %v529_v48 = vmul.f32 %v518_v43, %v1679_v11 }
 0x253   : > { %406 = vrot.lane.b32.xlu0 %v1676_v10, %s1550_s15  ;;  %v1771_v49 = vpop.permute.xlu1 %376 }
 0x257   : > { %v1777_v54 = vpop.permute.xlu1 %382 }
 0x25b   : > { %v429_v58 = vpop.permute.xlu1 %428 }
 0x25f   : > { %v431_v0 = vpop.permute.xlu1 %430 }
 0x2a9   : > { %v548_v41 = vpop.permute.xlu0 %547 }
 0x2aa   : > { %v556_v51 = vadd.f32 %v548_v41, %v532_v47 }
 0x2ad   : > { %v546_v42 = vpop.permute.xlu0 %545 }
 0x2ae   : > { %v555_v57 = vadd.f32 %v546_v42, %v531_v55 }
 0x2b1   : > { %v544_v45 = vpop.permute.xlu0 %543 }
 0x2b2   : > { %v554_v46 = vadd.f32 %v544_v45, %v530_v44  ;;  %v467_v44 = vmul.f32 %v394_v38, %v1777_v54 }
 0x2b4   : > { %571 = vrot.lane.b32.xlu1 %v554_v46, %s1543_s14  ;;  %v395_v46 = vld [vmem:[%s2003_s4 + $0x38] sm:$0xff] }
 0x2b5   : > { %v542_v50 = vpop.permute.xlu0 %541 }
 0x2b6   : > { %v553_v52 = vadd.f32 %v542_v50, %v529_v48  ;;  %v403_v48 = vld [vmem:[%s2004_s5 + $0x38] sm:$0xff] }
 0x2b8   : > { %575 = vrot.lane.b32.xlu1 %v556_v51, %s1543_s14  ;;  %569 = vrot.lane.b32.xlu0 %v553_v52, %s1543_s14 }
 0x2b9   : > { %v1775_v53 = vpop.permute.xlu0 %378 }
 0x2bc   : > { %408 = vrot.lane.b32.xlu1 %v1686_v13, %s1550_s15  ;;  %432 = vrot.lane.b32.xlu0 %v1686_v13, %s1549_s20 }
 0x2bd   : > { %v1784_v56 = vpop.permute.xlu0 %384 }
 0x2c0   : > { %410 = vrot.lane.b32.xlu1 %v1682_v12, %s1550_s15  ;;  %573 = vrot.lane.b32.xlu0 %v555_v57, %s1543_s14  ;;  %v558_v57 = vld [vmem:[%s2005_s6 + $0x8] sm:$0xff] }
 0x2c1   : > { %v405_v59 = vpop.permute.xlu0 %404 }
 0x2c2   : > { %v453_v60 = vsel %vm452_vm1, %v405_v59, %v429_v58  ;;  %v557_v59 = vld [vmem:[%s2005_s6] sm:$0xff] }
 0x2c3   : > { %v469_v62 = vmul.f32 %v453_v60, %v396_v33 }
 0x2c4   : > { %434 = vrot.lane.b32.xlu0 %v1682_v12, %s1549_s20  ;;  %412 = vrot.lane.b32.xlu1 %v1771_v49, %s1550_s15  ;;  %v402_v12 = vld [vmem:[%s2004_s5 + $0x30] sm:$0xff] }
 0x2c5   : > { %v477_v63 = vadd.f32 %v469_v62, %v461_v61  ;;  %v407_v1 = vpop.permute.xlu0 %406 }
 0x2c6   : > { %v454_v9 = vsel %vm452_vm1, %v407_v1, %v431_v0  ;;  %v559_v1 = vld [vmem:[%s2005_s6 + $0x10] sm:$0xff] }
 0x2c7   : > { %1339 = vmatprep.mubr.msk.f32.mxu1 %vm577_vm2, %v477_v63  ;;  %v470_v21 = vmul.f32 %v454_v9, %v1748_v28  ;;  %v463_v28 = vmul.f32 %v1704_v15, %v1686_v13 }
 0x2c8   : > { %436 = vrot.lane.b32.xlu0 %v1771_v49, %s1549_s20  ;;  %414 = vrot.lane.b32.xlu1 %v1775_v53, %s1550_s15 }
 0x2c9   : > { %v478_v31 = vadd.f32 %v470_v21, %v462_v27  ;;  %v563_v27 = vld [vmem:[%s2005_s6 + $0x30] sm:$0xff] }
 0x2cc   : > { %438 = vrot.lane.b32.xlu0 %v1775_v53, %s1549_s20  ;;  %416 = vrot.lane.b32.xlu1 %v1777_v54, %s1550_s15 }
 0x2d0   : > { %440 = vrot.lane.b32.xlu0 %v1777_v54, %s1549_s20  ;;  %418 = vrot.lane.b32.xlu1 %v1784_v56, %s1550_s15 }
 0x2d4   : > { %442 = vrot.lane.b32.xlu0 %v1784_v56, %s1549_s20  ;;  %s1551_s20 = smov 32  }
 0x326   : > { %v572_v2 = vpop.permute.xlu1 %571 }
 0x32a   : > { %v570_v3 = vpop.permute.xlu0 %569  ;;  %v576_v4 = vpop.permute.xlu1 %575 }
 0x32b   : > { %1331 = vmatprep.subr.msk.mxu1 %vm577_vm2, %v576_v4 }
 0x32c   : > { %1332 = vmatpush3.xpose.msk.msra.mxu1 %vm577_vm2, %v576_v4 }
 0x32e   : > { %v433_v5 = vpop.permute.xlu0 %432  ;;  %v409_v6 = vpop.permute.xlu1 %408 }
 0x32f   : > { %v455_v20 = vsel %vm452_vm1, %v409_v6, %v433_v5  ;;  %v562_v5 = vld [vmem:[%s2005_s6 + $0x28] sm:$0xff] }
 0x330   : > { %v471_v22 = vmul.f32 %v455_v20, %v1740_v23  ;;  %v392_v23 = vld [vmem:[%s2003_s4 + $0x20] sm:$0xff] }
 0x331   : > { %v465_v15 = vmul.f32 %v392_v23, %v1771_v49 }
 0x332   : > { %v574_v7 = vpop.permute.xlu0 %573  ;;  %v411_v8 = vpop.permute.xlu1 %410  ;;  %v479_v33 = vadd.f32 %v471_v22, %v463_v28  ;;  %v564_v22 = vld [vmem:[%s2005_s6 + $0x38] sm:$0xff] }
 0x333   : > { %1333 = vmatprep.subr.msk.mxu1 %vm577_vm2, %v574_v7 }
 0x334   : > { %1334 = vmatpush3.xpose.msk.msra.mxu1 %vm577_vm2, %v574_v7 }
 0x335   : > { %1335 = vmatprep.subr.msk.mxu1 %vm577_vm2, %v572_v2 }
 0x336   : > { %v435_v17 = vpop.permute.xlu0 %434  ;;  %v413_v19 = vpop.permute.xlu1 %412 }
 0x337   : > { %v456_v24 = vsel %vm452_vm1, %v411_v8, %v435_v17  ;;  %v561_v8 = vld [vmem:[%s2005_s6 + $0x20] sm:$0xff] }
 0x338   : > { %1336 = vmatpush3.xpose.msk.msra.mxu1 %vm577_vm2, %v572_v2  ;;  %v472_v32 = vmul.f32 %v456_v24, %v1733_v18  ;;  %v393_v18 = vld [vmem:[%s2003_s4 + $0x28] sm:$0xff] }
 0x339   : > { %1337 = vmatprep.subr.msk.mxu1 %vm577_vm2, %v570_v3  ;;  %v466_v42 = vmul.f32 %v393_v18, %v1775_v53  ;;  %v468_v53 = vmul.f32 %v395_v46, %v1784_v56  ;;  %v560_v56 = vld [vmem:[%s2005_s6 + $0x18] sm:$0xff] }
 0x33a   : > { %v437_v25 = vpop.permute.xlu0 %436  ;;  %v415_v26 = vpop.permute.xlu1 %414  ;;  %v480_v39 = vadd.f32 %v472_v32, %v464_v36 }
 0x33b   : > { %v457_v30 = vsel %vm452_vm1, %v413_v19, %v437_v25 }
 0x33c   : > { %1338 = vmatpush3.xpose.msk.msra.mxu1 %vm577_vm2, %v570_v3  ;;  %v473_v16 = vmul.f32 %v457_v30, %v400_v29 }
 0x33e   : > { %v439_v35 = vpop.permute.xlu0 %438  ;;  %v417_v37 = vpop.permute.xlu1 %416  ;;  %v481_v14 = vadd.f32 %v473_v16, %v465_v15 }
 0x33f   : > { %v458_v13 = vsel %vm452_vm1, %v415_v26, %v439_v35  ;;  %1340 = vmatmul.mubr.msk.f32.vlgmr.msra.gmra.mxu1 %vm577_vm2, %v478_v31 }
 0x340   : > { %1342 = vmatprep.mubr.msk.f32.mxu1 %vm577_vm2, %v479_v33  ;;  %v474_v40 = vmul.f32 %v458_v13, %v401_v34 }
 0x342   : > { %v441_v41 = vpop.permute.xlu0 %440  ;;  %v482_v47 = vadd.f32 %v474_v40, %v466_v42  ;;  %v419_v50 = vpop.permute.xlu1 %418 }
 0x343   : > { %v459_v43 = vsel %vm452_vm1, %v417_v37, %v441_v41  ;;  %1343 = vmatmul.mubr.msk.f32.gmra.mxu1 %vm577_vm2, %v480_v39 }
 0x344   : > { %v475_v45 = vmul.f32 %v459_v43, %v402_v12  ;;  %1345 = vmatprep.mubr.msk.f32.mxu1 %vm577_vm2, %v481_v14 }
 0x346   : > { %v483_v49 = vadd.f32 %v475_v45, %v467_v44  ;;  %v443_v51 = vpop.permute.xlu0 %442 }
 0x347   : > { %v460_v52 = vsel %vm452_vm1, %v419_v50, %v443_v51  ;;  %1346 = vmatmul.mubr.msk.f32.gmra.mxu1 %vm577_vm2, %v482_v47 }
 0x348   : > { %v476_v54 = vmul.f32 %v460_v52, %v403_v48  ;;  %1348 = vmatprep.mubr.msk.f32.mxu1 %vm577_vm2, %v483_v49 }
 0x34a   : > { %v484_v55 = vadd.f32 %v476_v54, %v468_v53 }
 0x34c   : > { %1349 = vmatmul.mubr.msk.f32.gmra.mxu1 %vm577_vm2, %v484_v55 }
 0x3ff   : > { %v1341_v58 = vpop.f32.mrf.mxu1 }
 0x400   : > { %v682_v60 = vadd.f32 %v1341_v58, %v558_v57 }
 0x401   : > { %v676_v61 = vpop.f32.mrf.mxu1 }
 0x402   : > { %v677_v62 = vadd.f32 %v676_v61, %v557_v59  ;;  %v719_v63 = vsel %vm715_vm3, %v682_v60, -inf }
 0x403   : > { %720 = vmax.xlane.f32.xlu0 %v719_v63  ;;  %v1344_v0 = vpop.f32.mrf.mxu1 }
 0x404   : > { %v692_v2 = vadd.f32 %v1344_v0, %v560_v56  ;;  %v716_v3 = vsel %vm715_vm3, %v677_v62, -inf }
 0x405   : > { %v686_v4 = vpop.f32.mrf.mxu1  ;;  %717 = vmax.xlane.f32.xlu1 %v716_v3 }
 0x406   : > { %v687_v6 = vadd.f32 %v686_v4, %v559_v1  ;;  %v725_v19 = vsel %vm715_vm3, %v692_v2, -inf }
 0x407   : > { %v1347_v7 = vpop.f32.mrf.mxu1 }
 0x408   : > { %v702_v9 = vadd.f32 %v1347_v7, %v562_v5  ;;  %v722_v17 = vsel %vm715_vm3, %v687_v6, -inf }
 0x409   : > { %v696_v20 = vpop.f32.mrf.mxu1  ;;  %723 = vmax.xlane.f32.xlu0 %v722_v17  ;;  %726 = vmax.xlane.f32.xlu1 %v725_v19 }
 0x40a   : > { %v697_v21 = vadd.f32 %v696_v20, %v561_v8  ;;  %v731_v26 = vsel %vm715_vm3, %v702_v9, -inf }
 0x40c   : > { %v1350_v24 = vpop.f32.mrf.mxu1  ;;  %v728_v25 = vsel %vm715_vm3, %v697_v21, -inf }
 0x40d   : > { %v712_v29 = vadd.f32 %v1350_v24, %v564_v22  ;;  %729 = vmax.xlane.f32.xlu0 %v728_v25  ;;  %732 = vmax.xlane.f32.xlu1 %v731_v26  ;;  %v939_v25 = vstv %s275_s21 }
 0x40e   : > { %v706_v30 = vpop.f32.mrf.mxu1 }
 0x40f   : > { %v707_v28 = vadd.f32 %v706_v30, %v563_v27  ;;  %v737_v23 = vsel %vm715_vm3, %v712_v29, -inf }
 0x411   : > { %738 = vmax.xlane.f32.xlu1 %v737_v23  ;;  %v734_v31 = vsel %vm715_vm3, %v707_v28, -inf }
 0x412   : > { %735 = vmax.xlane.f32.xlu0 %v734_v31 }
 0x422   : > { %788 = vrot.lane.b32.xlu1 %v1679_v11, %s1551_s20 }
 0x428   : > { %790 = vrot.lane.b32.xlu0 %v1676_v10, %s1551_s20  ;;  %s1487_s20 = scalar_lea.vmem %s1486_s19, 256 }
 0x429   : > { %p1489_p1 = scmp.lt.s32.totalorder %s1487_s20, %s1481_s18 }
 0x42b   : > { %p1490_p2 = por %p1489_p1, %p1488_p0 }
 0x42d   : > { %p1491_p3 = pnand %p1490_p2, %p1484_p13 }
 0x48c   : > { %v721_v32 = vpop.xlane.xlu0 %720 }
 0x48d   : > { %v741_v35 = vsub.f32 %v682_v60, %v721_v32 }
 0x48e   : > { %v718_v33 = vpop.xlane.xlu1 %717 }
 0x48f   : > { %v740_v16 = vsub.f32 %v677_v62, %v718_v33  ;;  %v750_v37 = vmul.f32 1.442695, %v741_v35 }
 0x491   : > { %v748_v34 = vmul.f32 1.442695, %v740_v16 }
 0x492   : > { %v724_v36 = vpop.xlane.xlu0 %723  ;;  %v727_v13 = vpop.xlane.xlu1 %726 }
 0x493   : > { %1441 = vpow2.f32 %v748_v34  ;;  %v742_v15 = vsub.f32 %v687_v6, %v724_v36  ;;  %v743_v38 = vsub.f32 %v692_v2, %v727_v13 }
 0x495   : > { %v752_v18 = vmul.f32 1.442695, %v742_v15  ;;  %v754_v10 = vmul.f32 1.442695, %v743_v38 }
 0x496   : > { %v730_v39 = vpop.xlane.xlu0 %729  ;;  %v733_v40 = vpop.xlane.xlu1 %732 }
 0x497   : > { %1443 = vpow2.f32 %v752_v18  ;;  %v744_v12 = vsub.f32 %v697_v21, %v730_v39  ;;  %v745_v14 = vsub.f32 %v702_v9, %v733_v40 }
 0x498   : > { %1445 = vpow2.f32 %v750_v37 }
 0x499   : > { %v756_v11 = vmul.f32 1.442695, %v744_v12  ;;  %v758_v41 = vmul.f32 1.442695, %v745_v14 }
 0x49a   : > { %v739_v42 = vpop.xlane.xlu1 %738 }
 0x49b   : > { %1447 = vpow2.f32 %v756_v11  ;;  %v747_v43 = vsub.f32 %v712_v29, %v739_v42  ;;  %v736_v44 = vpop.xlane.xlu0 %735 }
 0x49c   : > { %1449 = vpow2.f32 %v758_v41  ;;  %v746_v45 = vsub.f32 %v707_v28, %v736_v44 }
 0x49d   : > { %v762_v46 = vmul.f32 1.442695, %v747_v43  ;;  %1451 = vpow2.f32 %v754_v10 }
 0x49e   : > { %v760_v47 = vmul.f32 1.442695, %v746_v45  ;;  %v789_v50 = vpop.permute.xlu1 %788 }
 0x49f   : > { %1453 = vpow2.f32 %v762_v46  ;;  %v791_v48 = vpop.permute.xlu0 %790 }
 0x4a0   : > { %v1442_v49 = vpop.eup %1441  ;;  %1455 = vpow2.f32 %v760_v47  ;;  %1351 = vmatprep.subr.mxu0 %v791_v48 }
 0x4a1   : > { %1352 = vmatpush3.msra.mxu0 %v791_v48  ;;  %1359 = vmatprep.mubr.msk.f32.mxu0 %vm715_vm3, %v1442_v49  ;;  %v764_v51 = vsel %vm715_vm3, %v1442_v49, 0.0 }
 0x4a2   : > { %765 = vadd.xlane.f32.xlu0 %v764_v51  ;;  %1353 = vmatprep.subr.mxu0 %v789_v50  ;;  %v984_v51 = vld [vmem:[%s2002_s3 + $0x18] sm:$0xff] }
 0x4a3   : > { %1354 = vmatpush3.msra.mxu0 %v789_v50 }
 0x4a4   : > { %v1444_v52 = vpop.eup %1443  ;;  %1355 = vmatprep.subr.mxu0 %v791_v48 }
 0x4a5   : > { %1356 = vmatpush3.msra.mxu0 %v791_v48  ;;  %v770_v53 = vsel %vm715_vm3, %v1444_v52, 0.0  ;;  %v1446_v54 = vpop.eup %1445 }
 0x4a6   : > { %771 = vadd.xlane.f32.xlu1 %v770_v53  ;;  %1357 = vmatprep.subr.mxu0 %v789_v50  ;;  %v767_v1 = vsel %vm715_vm3, %v1446_v54, 0.0  ;;  %v988_v53 = vld [vmem:[%s2002_s3 + $0x38] sm:$0xff] }
 0x4a7   : > { %1358 = vmatpush3.msra.mxu0 %v789_v50  ;;  %1371 = vmatprep.subr.mxu1 %v988_v53 }
 0x4a8   : > { %v1448_v55 = vpop.eup %1447  ;;  %1360 = vmatmul.mubr.msk.f32.vlgmr.msra.gmra.mxu0 %vm715_vm3, %v1446_v54  ;;  %1382 = vmatprep.subr.mxu0 %v984_v51  ;;  %v982_v54 = vld [vmem:[%s2002_s3 + $0x8] sm:$0xff] }
 0x4a9   : > { %v1450_v57 = vpop.eup %1449  ;;  %1362 = vmatprep.mubr.msk.f32.mxu0 %vm715_vm3, %v1444_v52  ;;  %v776_v58 = vsel %vm715_vm3, %v1448_v55, 0.0  ;;  %1383 = vmatpush3.msra.mxu0 %v984_v51  ;;  %v983_v52 = vld [vmem:[%s2002_s3 + $0x10] sm:$0xff] }
 0x4aa   : > { %777 = vadd.xlane.f32.xlu1 %v776_v58  ;;  %v779_v59 = vsel %vm715_vm3, %v1450_v57, 0.0  ;;  %v1452_v60 = vpop.eup %1451  ;;  %1384 = vmatprep.subr.mxu0 %v983_v52  ;;  %v986_v58 = vld [vmem:[%s2002_s3 + $0x28] sm:$0xff] }
 0x4ab   : > { %780 = vadd.xlane.f32.xlu0 %v779_v59  ;;  %v773_v0 = vsel %vm715_vm3, %v1452_v60, 0.0  ;;  %1385 = vmatpush3.msra.mxu0 %v983_v52  ;;  %v985_v59 = vld [vmem:[%s2002_s3 + $0x20] sm:$0xff] }
 0x4ac   : > { %v1454_v61 = vpop.eup %1453  ;;  %1363 = vmatmul.mubr.msk.f32.gmra.mxu0 %vm715_vm3, %v1452_v60  ;;  %1386 = vmatprep.subr.mxu0 %v982_v54 }
 0x4ad   : > { %v1456_v56 = vpop.eup %1455  ;;  %1365 = vmatprep.mubr.msk.f32.mxu0 %vm715_vm3, %v1448_v55  ;;  %v785_v62 = vsel %vm715_vm3, %v1454_v61, 0.0  ;;  %1372 = vmatpush3.msra.mxu1 %v988_v53  ;;  %v987_v55 = vld [vmem:[%s2002_s3 + $0x30] sm:$0xff] }
 0x4ae   : > { %786 = vadd.xlane.f32.xlu1 %v785_v62  ;;  %v782_v63 = vsel %vm715_vm3, %v1456_v56, 0.0  ;;  %1387 = vmatpush3.msra.mxu0 %v982_v54 }
 0x4af   : > { %783 = vadd.xlane.f32.xlu0 %v782_v63  ;;  %1373 = vmatprep.subr.mxu1 %v987_v55 }
 0x4b0   : > { %1366 = vmatmul.mubr.msk.f32.gmra.mxu0 %vm715_vm3, %v1450_v57  ;;  %v981_v57 = vld [vmem:[%s2002_s3] sm:$0xff]  ;;  %1374 = vmatpush3.msra.mxu1 %v987_v55 }
 0x4b1   : > { %1368 = vmatprep.mubr.msk.f32.mxu0 %vm715_vm3, %v1456_v56  ;;  %1388 = vmatprep.subr.mxu0 %v981_v57 }
 0x4b2   : > { %774 = vadd.xlane.f32.xlu1 %v773_v0  ;;  %1389 = vmatpush3.msra.mxu0 %v981_v57 }
 0x4b3   : > { %768 = vadd.xlane.f32.xlu0 %v767_v1  ;;  %1375 = vmatprep.subr.mxu1 %v986_v58 }
 0x4b4   : > { %1369 = vmatmul.mubr.msk.f32.gmra.mxu0 %vm715_vm3, %v1454_v61  ;;  %1376 = vmatpush3.msra.mxu1 %v986_v58 }
 0x4b5   : > { %1377 = vmatprep.subr.mxu1 %v985_v59 }
 0x4b6   : > { %1378 = vmatpush3.msra.mxu1 %v985_v59 }
 0x52b   : > { %v766_v2 = vpop.xlane.xlu0 %765 }
 0x52f   : > { %v772_v3 = vpop.xlane.xlu1 %771 }
 0x533   : > { %v778_v5 = vpop.xlane.xlu1 %777 }
 0x534   : > { %v781_v4 = vpop.xlane.xlu0 %780 }
 0x535   : > { %1457 = vrcp.f32 %v781_v4 }
 0x536   : > { %1459 = vrcp.f32 %v766_v2 }
 0x537   : > { %v787_v7 = vpop.xlane.xlu1 %786  ;;  %1461 = vrcp.f32 %v778_v5 }
 0x538   : > { %v784_v6 = vpop.xlane.xlu0 %783  ;;  %1463 = vrcp.f32 %v787_v7 }
 0x53b   : > { %v775_v9 = vpop.xlane.xlu1 %774 }
 0x53c   : > { %v769_v8 = vpop.xlane.xlu0 %768 }
 0x53d   : > { %1465 = vrcp.f32 %v769_v8 }
 0x53e   : > { %1467 = vrcp.f32 %v784_v6 }
 0x53f   : > { %1469 = vrcp.f32 %v772_v3 }
 0x540   : > { %1471 = vrcp.f32 %v775_v9 }
 0x542   : > { %v1458_v22 = vpop.eup %1457 }
 0x543   : > { %v1460_v26 = vpop.eup %1459 }
 0x544   : > { %v1462_v29 = vpop.eup %1461 }
 0x545   : > { %v1464_v28 = vpop.eup %1463 }
 0x54a   : > { %v1466_v32 = vpop.eup %1465 }
 0x54b   : > { %v1468_v13 = vpop.eup %1467 }
 0x54c   : > { %v1470_v18 = vpop.eup %1469 }
 0x54d   : > { %v1472_v12 = vpop.eup %1471 }
 0x568   : > { %v1361_v17 = vpop.f32.mrf.mxu0 }
 0x569   : > { %v932_v16 = vmul.f32 %v1466_v32, %v1361_v17 }
 0x56a   : > { %v884_v19 = vpop.f32.mrf.mxu0 }
 0x56b   : > { %v931_v34 = vmul.f32 %v1460_v26, %v884_v19 }
 0x56c   : > { %v1364_v20 = vpop.f32.mrf.mxu0 }
 0x56d   : > { %v934_v14 = vmul.f32 %v1472_v12, %v1364_v20 }
 0x56e   : > { %v894_v21 = vpop.f32.mrf.mxu0 }
 0x56f   : > { %v933_v11 = vmul.f32 %v1470_v18, %v894_v21 }
 0x570   : > { %v1367_v24 = vpop.f32.mrf.mxu0 }
 0x571   : > { %v936_v27 = vmul.f32 %v1458_v22, %v1367_v24 }
 0x572   : > { %v904_v30 = vpop.f32.mrf.mxu0 }
 0x573   : > { %v941_v23 = vmul.f32 %v939_v25, %v936_v27  ;;  %v935_v31 = vmul.f32 %v1462_v29, %v904_v30 }
 0x574   : > { %v1370_v33 = vpop.f32.mrf.mxu0 }
 0x575   : > { %v940_v35 = vmul.f32 %v939_v25, %v935_v31  ;;  %v938_v36 = vmul.f32 %v1464_v28, %v1370_v33  ;;  %v1920_v40 = vsub.f32 %v932_v16, %v941_v23 }
 0x576   : > { %v914_v15 = vpop.f32.mrf.mxu0 }
 0x577   : > { %v943_v37 = vmul.f32 %v939_v25, %v938_v36  ;;  %v937_v38 = vmul.f32 %v1468_v13, %v914_v15  ;;  %v944_v39 = vsub.f32 %v931_v34, %v940_v35  ;;  %v949_v44 = vmul.f32 %v1920_v40, %v1920_v40 }
 0x579   : > { %v942_v41 = vmul.f32 %v939_v25, %v937_v38  ;;  %v948_v10 = vmul.f32 %v944_v39, %v944_v39  ;;  %v947_v45 = vsub.f32 %v934_v14, %v943_v37  ;;  %v955_v48 = vsel %vm715_vm3, %v949_v44, 0.0 }
 0x57b   : > { %v952_v42 = vsel %vm715_vm3, %v948_v10, 0.0  ;;  %v946_v43 = vsub.f32 %v933_v11, %v942_v41  ;;  %v951_v49 = vmul.f32 %v947_v45, %v947_v45 }
 0x57c   : > { %953 = vadd.xlane.f32.xlu0 %v952_v42 }
 0x57d   : > { %v950_v46 = vmul.f32 %v946_v43, %v946_v43  ;;  %v961_v50 = vsel %vm715_vm3, %v951_v49, 0.0 }
 0x57f   : > { %v958_v47 = vsel %vm715_vm3, %v950_v46, 0.0 }
 0x580   : > { %959 = vadd.xlane.f32.xlu1 %v958_v47  ;;  %956 = vadd.xlane.f32.xlu0 %v955_v48 }
 0x584   : > { %962 = vadd.xlane.f32.xlu1 %v961_v50 }
 0x605   : > { %v954_v60 = vpop.xlane.xlu0 %953 }
 0x606   : > { %v965_v61 = vmul.f32 0.03125, %v954_v60 }
 0x608   : > { %v969_v56 = vadd.f32 1e-06, %v965_v61 }
 0x609   : > { %v957_v62 = vpop.xlane.xlu0 %956  ;;  %v960_v63 = vpop.xlane.xlu1 %959 }
 0x60a   : > { %1473 = vrsqrt.f32 %v969_v56  ;;  %v966_v0 = vmul.f32 0.03125, %v957_v62  ;;  %v967_v1 = vmul.f32 0.03125, %v960_v63 }
 0x60c   : > { %v970_v2 = vadd.f32 1e-06, %v966_v0  ;;  %v971_v3 = vadd.f32 1e-06, %v967_v1 }
 0x60d   : > { %v963_v4 = vpop.xlane.xlu1 %962 }
 0x60e   : > { %1475 = vrsqrt.f32 %v970_v2  ;;  %v968_v5 = vmul.f32 0.03125, %v963_v4 }
 0x60f   : > { %1477 = vrsqrt.f32 %v971_v3 }
 0x610   : > { %v972_v6 = vadd.f32 1e-06, %v968_v5 }
 0x612   : > { %1479 = vrsqrt.f32 %v972_v6 }
 0x617   : > { %v1474_v7 = vpop.eup %1473 }
 0x618   : > { %v977_v8 = vmul.f32 %v1474_v7, %v944_v39 }
 0x61a   : > { %1390 = vmatprep.mubr.msk.f32.mxu0 %vm715_vm3, %v977_v8 }
 0x61b   : > { %v1476_v9 = vpop.eup %1475 }
 0x61c   : > { %v1478_v17 = vpop.eup %1477  ;;  %v978_v19 = vmul.f32 %v1476_v9, %v1920_v40 }
 0x61d   : > { %v979_v20 = vmul.f32 %v1478_v17, %v946_v43 }
 0x61e   : > { %1391 = vmatmul.mubr.msk.f32.vlgmr.msra.gmra.mxu0 %vm715_vm3, %v978_v19 }
 0x61f   : > { %v1480_v21 = vpop.eup %1479  ;;  %1379 = vmatprep.mubr.msk.f32.mxu1 %vm715_vm3, %v979_v20 }
 0x620   : > { %v980_v22 = vmul.f32 %v1480_v21, %v947_v45 }
 0x622   : > { %1380 = vmatmul.mubr.msk.f32.vlgmr.msra.gmra.mxu1 %vm715_vm3, %v980_v22 }
 0x6de   : > { %v1392_v24 = vpop.f32.mrf.mxu0 }
 0x6e0   : > { %v1142_v29 = vpop.f32.mrf.mxu0 }
 0x6e2   : > { %v1381_v25 = vpop.f32.mrf.mxu1 }
 0x6e3   : > { %v1148_v26 = vadd.f32 %v1392_v24, %v1381_v25 }
 0x6e4   : > { %v1061_v27 = vpop.f32.mrf.mxu1 }
 0x6e5   : > { %1152 = vrot.lane.b32.xlu0 %v1148_v26, %s1543_s14  ;;  %v1143_v30 = vadd.f32 %v1142_v29, %v1061_v27  ;;  %s1158_s14 = scalar_lea.sflag [#allocation4], %s268_s24 }
 0x757   : > { %v1153_v28 = vpop.permute.xlu0 %1152 }
 0x758   : > { %v1155_v23 = vsel %vm288_vm0, %v1143_v30, %v1153_v28 }
 0x759   : > { %1156 = vst [vmem:[%s270_s9] sm:$0xff] %v1155_v23 }
 0x75a   : > { %1494 = shalt.err (!%p1491_p3)
}
 0x75b   : > { %s1495_s21 = scalar_lea.hbm %s1963_s17, 128  ;;  %s1499_s24 = scalar_lea.hbm %s2006_s7, 256 }
 0x75c   : > { %p1496_p4 = scmp.ne.s32.totalorder %s1963_s17, %s1495_s21  ;;  %p1500_p9 = scmp.lt.s32.totalorder %s1963_s17, %s2006_s7 }
 0x75d   : > { %p1501_p10 = scmp.lt.s32.totalorder %s1499_s24, %s1495_s21 }
 0x75e   : > { %p1497_p7 = pnand %p1496_p4, %p1634_p5 }
 0x75f   : > { %p1502_p11 = por %p1501_p10, %p1500_p9 }
 0x760   : > { %p1498_p8 = pneg %p1497_p7 }
 0x762   : > { %p1503_p12 = pnand %p1502_p11, %p1498_p8 }
 0x764   : > { %1506 = shalt.err (!%p1503_p12)
}
 0x765   : > { %1393 = dma.vmem_to_hbm [thread:$0]  (%p1634_p5), %s1172_s10, 128, %s1963_s17, %s1158_s14  }
 0x766 PF: > { %p1399_p13 = scmp.ge.s32.totalorder %s1541_s29, 2  ;;  %s1183_s9 = sand.u32 1, %s1529_s26  }
 0x767   : > { %s1184_s15 = scalar_lea.sflag [#allocation4], %s1183_s9 }
 0x768   : > { %p1396_p0 = pnand %p1399_p13, %p1638_p6 }
 0x76a   : > { %p1397_p1 = pneg %p1396_p0 }
 0x76c   : > { %1524 = dma.done.wait (%p1397_p1), %s1184_s15, 128  }
 0x76d   : > { %1526 = vsyncadd (%p1397_p1), %s1184_s15, 4294967168  ;;  %p18_p2 = scmp.ge.s32.totalorder %s1621_s8, 4   ;;  %s2009_s26 = smov %s1533_s27 }
 0x76e   : > { %s2010_s27 = smov %s1537_s28  ;;  %s2011_s28 = smov %s1632_s11 }
 0x76f   : > { %s2012_s29 = smov %s1621_s8  ;;  %20 = sbr.rel (!%p18_p2) target bundleno = 5 (0x5), region = 83 }
 0x774   :  { %1189 = vsyncpa [#allocation4], 1 }
 0x775   :  { %1191 = vsyncpa [#allocation4 + $0x1], 1 }

</bundles_post_ra>
